<compile_context>
chip_gen: v7x
topology: tpu7x:2x2x1
jax: 0.10.0
libtpu: 0.0.40
codegen_flags: <defaults>
</compile_context>

<pallas_src>
import jax
import jax.numpy as jnp
from jax.experimental import pallas as pl
from jax.experimental.pallas import tpu as pltpu

LAYERS = [2, 50, 3]
HIDDEN_PAD = 64    # hidden 50 -> 64 (sublane dim, multiple of 8)
OUT_PAD = 8        # output 3  -> 8  (sublane dim, multiple of 8)
TB_MAX = 2048      # cap per-step batch tile (keeps h at <= 512 KiB)


def _round_up(n, m):
    return ((n + m - 1) // m) * m


def _num_tensorcores():
    """Best-effort TC count per chip (v5e/v6e: 1, v7x: 2). Heuristic only."""
    try:
        kind = getattr(jax.devices()[0], "device_kind", "") or ""
        return 2 if "v7" in kind.lower() else 1
    except Exception:
        return 1


def _choose_tb(batch, n_cores):
    """One full-sized step per TensorCore; cap tile so VMEM stays tiny."""
    per_core = pl.cdiv(batch, n_cores)
    return max(128, min(TB_MAX, _round_up(per_core, 128)))


def mlp_kernel(x_ref, w1_ref, b1_ref, w2_ref, b2_ref, o_ref):
    x = x_ref[...]                                    # (2, tb)   batch on lanes
    # --- Layer 1 (in=2 -> hidden=64 padded): VPU outer-product FMAs ---
    # h[j, b] = w1[0, j] * x[0, b] + w1[1, j] * x[1, b] + b1[j]
    h = (w1_ref[:, 0:1] * x[0:1, :]
         + w1_ref[:, 1:2] * x[1:2, :]
         + b1_ref[...])                               # (64, tb)
    h = jnp.maximum(h, 0.0)                           # F.relu
    # --- Layer 2 (hidden=64 -> out=8 padded): MXU matmul, no activation ---
    out = jnp.dot(w2_ref[...], h, preferred_element_type=jnp.float32) + b2_ref[...]
    o_ref[...] = out.astype(o_ref.dtype)              # (8, tb)


def prepare_params(w1, b1, w2, b2):
    """Pad + transpose parameters ONCE (outside the per-call forward path).

    w1: (2, 50), b1: (1, 50), w2: (50, 3), b2: (1, 3)   (x @ W + b convention)
    Returns feature-major padded params:
      w1T: (64, 2), b1T: (64, 1), w2T: (8, 64), b2T: (8, 1)
    """
    in_dim, hidden = w1.shape
    out_dim = w2.shape[1]
    w1T = jnp.zeros((HIDDEN_PAD, in_dim), jnp.float32).at[:hidden, :].set(w1.T)
    b1T = jnp.zeros((HIDDEN_PAD, 1), jnp.float32).at[:hidden, :].set(b1.T)
    w2T = jnp.zeros((OUT_PAD, HIDDEN_PAD), jnp.float32).at[:out_dim, :hidden].set(w2.T)
    b2T = jnp.zeros((OUT_PAD, 1), jnp.float32).at[:out_dim, :].set(b2.T)
    return w1T, b1T, w2T, b2T


def mlp_forward(x, padded_params, *, out_dim=3, tb=None):
    """x: (B, 2) f32. padded_params: output of prepare_params. Returns (B, out_dim)."""
    w1T, b1T, w2T, b2T = padded_params
    B, in_dim = x.shape

    if tb is None:
        tb = _choose_tb(B, _num_tensorcores())
    num_tiles = pl.cdiv(B, tb)
    Bp = num_tiles * tb

    # Feature-major input: batch on the lane axis; pad batch to a tile multiple.
    xT = jnp.zeros((in_dim, Bp), jnp.float32).at[:, :B].set(x.T)

    outT = pl.pallas_call(
        mlp_kernel,
        out_shape=jax.ShapeDtypeStruct((OUT_PAD, Bp), jnp.float32),
        grid=(num_tiles,),
        in_specs=[
            # batch-tiled activations (lane-dense)
            pl.BlockSpec((in_dim, tb), lambda i: (0, i)),
            # weights / biases: constant index_map -> VMEM-resident, no re-DMA
            pl.BlockSpec((HIDDEN_PAD, in_dim), lambda i: (0, 0)),
            pl.BlockSpec((HIDDEN_PAD, 1), lambda i: (0, 0)),
            pl.BlockSpec((OUT_PAD, HIDDEN_PAD), lambda i: (0, 0)),
            pl.BlockSpec((OUT_PAD, 1), lambda i: (0, 0)),
        ],
        out_specs=pl.BlockSpec((OUT_PAD, tb), lambda i: (0, i)),
        compiler_params=pltpu.CompilerParams(
            dimension_semantics=("parallel",),   # shards steps across v7x's 2 TCs
        ),
    )(xT, w1T, b1T, w2T, b2T)

    return outT[:out_dim, :B].T


def init_params(key, layers):
    """Deterministic init mimicking nn.Linear's U(-1/sqrt(fan_in), 1/sqrt(fan_in))."""
    params = []
    for in_dim, out_dim in zip(layers, layers[1:]):
        key, kw, kb = jax.random.split(key, 3)
        bound = 1.0 / jnp.sqrt(jnp.float32(in_dim))
        w = jax.random.uniform(kw, (in_dim, out_dim), jnp.float32, -bound, bound)
        b = jax.random.uniform(kb, (1, out_dim), jnp.float32, -bound, bound)
        params.append((w, b))
    return params


def reference_forward(x, params):
    # Pure-JAX reference for correctness checking.
    h = x
    for i, (w, b) in enumerate(params):
        h = h @ w + b
        if i < len(params) - 1:
            h = jnp.maximum(h, 0.0)
    return h


if __name__ == "__main__":
    key = jax.random.PRNGKey(0)
    key, kx = jax.random.split(key)

    # Batch intentionally NOT a multiple of the tile to exercise pad + slice-back.
    batch = 250
    x = jax.random.normal(kx, (batch, LAYERS[0]), jnp.float32)

    (w1, b1), (w2, b2) = init_params(key, LAYERS)
    padded = prepare_params(w1, b1, w2, b2)   # once, outside the forward path

    # Auto tile choice (single step on 1-TC chips, balanced steps on v7x).
    out = jax.block_until_ready(mlp_forward(x, padded, out_dim=LAYERS[-1]))
    # Force a multi-step grid too, to exercise the batch-tiled path.
    out_multi = jax.block_until_ready(mlp_forward(x, padded, out_dim=LAYERS[-1], tb=128))

    ref = reference_forward(x, [(w1, b1), (w2, b2)])
    assert out.shape == (batch, LAYERS[-1])
    assert jnp.allclose(out, ref, atol=1e-5, rtol=1e-5)
    assert jnp.allclose(out_multi, ref, atol=1e-5, rtol=1e-5)

    print("KERNEL_OK")
</pallas_src>

<mosaic_0001>
module attributes {stable_mosaic.version = 11 : i64} {
  func.func @mlp_kernel(%arg0: i32, %arg1: memref<2x256xf32, #tpu.memory_space<vmem>>, %arg2: memref<64x2xf32, #tpu.memory_space<vmem>>, %arg3: memref<64x1xf32, #tpu.memory_space<vmem>>, %arg4: memref<8x64xf32, #tpu.memory_space<vmem>>, %arg5: memref<8x1xf32, #tpu.memory_space<vmem>>, %arg6: memref<8x256xf32, #tpu.memory_space<vmem>>) attributes {dimension_semantics = [#tpu.dimension_semantics<parallel>], iteration_bounds = array<i64: 1>, scalar_prefetch = 0 : i64, scratch_operands = 0 : i64, tpu.core_type = #tpu.core_type<tc>, window_params = [{transform_indices = @transform_0, window_bounds = array<i64: 2, 256>}, {pipeline_mode = #tpu.pipeline_mode<synchronous>, transform_indices = @transform_1, window_bounds = array<i64: 64, 2>}, {pipeline_mode = #tpu.pipeline_mode<synchronous>, transform_indices = @transform_2, window_bounds = array<i64: 64, 1>}, {pipeline_mode = #tpu.pipeline_mode<synchronous>, transform_indices = @transform_3, window_bounds = array<i64: 8, 64>}, {pipeline_mode = #tpu.pipeline_mode<synchronous>, transform_indices = @transform_4, window_bounds = array<i64: 8, 1>}, {transform_indices = @transform_5, window_bounds = array<i64: 8, 256>}]} {
    %c0 = arith.constant 0 : index
    %c0_0 = arith.constant 0 : index
    %0 = vector.load %arg1[%c0, %c0_0] : memref<2x256xf32, #tpu.memory_space<vmem>>, vector<2x256xf32>
    %c0_1 = arith.constant 0 : index
    %c0_2 = arith.constant 0 : index
    %1 = vector.load %arg2[%c0_1, %c0_2] : memref<64x2xf32, #tpu.memory_space<vmem>>, vector<64x1xf32>
    %2 = vector.extract_strided_slice %0 {offsets = [0, 0], sizes = [1, 256], strides = [1, 1]} : vector<2x256xf32> to vector<1x256xf32>
    %3 = vector.broadcast %1 : vector<64x1xf32> to vector<64x256xf32>
    %4 = vector.broadcast %2 : vector<1x256xf32> to vector<64x256xf32>
    %5 = arith.mulf %3, %4 : vector<64x256xf32>
    %c0_3 = arith.constant 0 : index
    %c1 = arith.constant 1 : index
    %6 = vector.load %arg2[%c0_3, %c1] : memref<64x2xf32, #tpu.memory_space<vmem>>, vector<64x1xf32>
    %7 = vector.extract_strided_slice %0 {offsets = [1, 0], sizes = [1, 256], strides = [1, 1]} : vector<2x256xf32> to vector<1x256xf32>
    %8 = vector.broadcast %6 : vector<64x1xf32> to vector<64x256xf32>
    %9 = vector.broadcast %7 : vector<1x256xf32> to vector<64x256xf32>
    %10 = arith.mulf %8, %9 : vector<64x256xf32>
    %11 = arith.addf %5, %10 : vector<64x256xf32>
    %c0_4 = arith.constant 0 : index
    %c0_5 = arith.constant 0 : index
    %12 = vector.load %arg3[%c0_4, %c0_5] : memref<64x1xf32, #tpu.memory_space<vmem>>, vector<64x1xf32>
    %13 = vector.broadcast %12 : vector<64x1xf32> to vector<64x256xf32>
    %14 = arith.addf %11, %13 : vector<64x256xf32>
    %cst = arith.constant 0.000000e+00 : f32
    %15 = vector.broadcast %cst : f32 to vector<64x256xf32>
    %16 = arith.maximumf %14, %15 : vector<64x256xf32>
    %c0_6 = arith.constant 0 : index
    %c0_7 = arith.constant 0 : index
    %17 = vector.load %arg4[%c0_6, %c0_7] : memref<8x64xf32, #tpu.memory_space<vmem>>, vector<8x64xf32>
    %cst_8 = arith.constant dense<0.000000e+00> : vector<8x256xf32>
    %18 = tpu.matmul %17, %16, %cst_8 {dimension_numbers = #tpu.dot_dimension_numbers<[1], [0], [0], [1], [0, 0, 1, 1], [], []>} : vector<8x64xf32>, vector<64x256xf32>, vector<8x256xf32> -> vector<8x256xf32>
    %c0_9 = arith.constant 0 : index
    %c0_10 = arith.constant 0 : index
    %19 = vector.load %arg5[%c0_9, %c0_10] : memref<8x1xf32, #tpu.memory_space<vmem>>, vector<8x1xf32>
    %20 = vector.broadcast %19 : vector<8x1xf32> to vector<8x256xf32>
    %21 = arith.addf %18, %20 : vector<8x256xf32>
    %c0_11 = arith.constant 0 : index
    %c0_12 = arith.constant 0 : index
    %22 = vector.load %arg6[%c0_11, %c0_12] : memref<8x256xf32, #tpu.memory_space<vmem>>, vector<8x256xf32>
    tpu.vector_store %arg6[%c0_11, %c0_12], %21 {strides = array<i32>} : memref<8x256xf32, #tpu.memory_space<vmem>>, vector<8x256xf32>,
    return
  }
  func.func @transform_0(%arg0: i32) -> (i32, i32) {
    %c0_i32 = arith.constant 0 : i32
    %c0_i32_0 = arith.constant 0 : i32
    return %c0_i32, %arg0 : i32, i32
  }
  func.func @transform_1(%arg0: i32) -> (i32, i32) {
    %c0_i32 = arith.constant 0 : i32
    %c0_i32_0 = arith.constant 0 : i32
    %c0_i32_1 = arith.constant 0 : i32
    return %c0_i32, %c0_i32_0 : i32, i32
  }
  func.func @transform_2(%arg0: i32) -> (i32, i32) {
    %c0_i32 = arith.constant 0 : i32
    %c0_i32_0 = arith.constant 0 : i32
    %c0_i32_1 = arith.constant 0 : i32
    return %c0_i32, %c0_i32_0 : i32, i32
  }
  func.func @transform_3(%arg0: i32) -> (i32, i32) {
    %c0_i32 = arith.constant 0 : i32
    %c0_i32_0 = arith.constant 0 : i32
    %c0_i32_1 = arith.constant 0 : i32
    return %c0_i32, %c0_i32_0 : i32, i32
  }
  func.func @transform_4(%arg0: i32) -> (i32, i32) {
    %c0_i32 = arith.constant 0 : i32
    %c0_i32_0 = arith.constant 0 : i32
    %c0_i32_1 = arith.constant 0 : i32
    return %c0_i32, %c0_i32_0 : i32, i32
  }
  func.func @transform_5(%arg0: i32) -> (i32, i32) {
    %c0_i32 = arith.constant 0 : i32
    %c0_i32_0 = arith.constant 0 : i32
    return %c0_i32, %arg0 : i32, i32
  }
}

</mosaic_0001>

<bundles_post_ra>
// kernel: tpu_custom_call.1
= control target key start
LH: loop header
LB: loop body
LE: loop exit
PB: predicated region body
PF: predicated region fallthrough
CT: control target
= control target key end

     0   :  { %v420_v2 = vmov 1   ;;  %s571_s0 = inlined_call_operand.vmem [shape: f32[2,256], index: 0, kind: input, shape index: {}]   ;;  %s572_s1 = inlined_call_operand.vmem [shape: f32[64,2], index: 1, kind: input, shape index: {}]   ;;  %s573_s2 = inlined_call_operand.vmem [shape: f32[64,1], index: 2, kind: input, shape index: {}]   ;;  %s574_s3 = inlined_call_operand.vmem [shape: f32[8,64], index: 3, kind: input, shape index: {}]   ;;  %s575_s4 = inlined_call_operand.vmem [shape: f32[8,1], index: 4, kind: input, shape index: {}]   ;;  %s576_s5 = inlined_call_operand.hbm [shape: f32[8,256], index: 5, kind: output, shape index: {}]  }
   0x1   :  { %v24_v0 = vld [vmem:[%s572_s1 + $0x10] sm:$0xff]  ;;  %v22_v1 = vld [vmem:[%s572_s1] sm:$0xff]  ;;  %388 = vset.pattern.permute.xlu0 %v420_v2  ;;  %386 = vset.pattern.permute.xlu1 %v420_v2  ;;  %v23_v4 = vld [vmem:[%s572_s1 + $0x8] sm:$0xff] }
   0x2   :  { %114 = vperm.xlu0 %388, %v24_v0   ;;  %106 = vperm.xlu1 %386, %v22_v1   ;;  %v26_v3 = vld [vmem:[%s572_s1 + $0x20] sm:$0xff] }
   0x6   :  { %122 = vperm.xlu0 %388, %v26_v3   ;;  %110 = vperm.xlu1 %386, %v23_v4  }
   0x7   :  { %10 = vsyncpa [#allocation3], 0  ;;  %v28_v5 = vld [vmem:[%s572_s1 + $0x30] sm:$0xff]  ;;  %v25_v6 = vld [vmem:[%s572_s1 + $0x18] sm:$0xff]  ;;  %v421_v7 = vmov 0   ;;  %v422_v19 = vmov 0.0   ;;  %v71_v20 = vlaneseq }
   0x8   :  { %v187_v8 = vld [vmem:[%s573_s2] sm:$0xff]  ;;  %v188_v9 = vld [vmem:[%s573_s2 + $0x8] sm:$0xff]  ;;  %v190_v11 = vld [vmem:[%s573_s2 + $0x18] sm:$0xff]  ;;  %342 = vmatprep.mubr.f32.mxu0 %v422_v19  ;;  %vm274_vm0 = vcmask 523264   ;;  %s423_s27 = smov [#allocation2]  }
   0x9   :  { %v27_v10 = vld [vmem:[%s572_s1 + $0x28] sm:$0xff]  ;;  %v189_v13 = vld [vmem:[%s573_s2 + $0x10] sm:$0xff]  ;;  %v268_v14 = vld [vmem:[%s575_s4] sm:$0xff]  ;;  %v72_v23 = vshrl.u32 %v71_v20, 7  ;;  %s357_s28 = sshll.u32 %s423_s27, 4  ;;  %s358_s28 = int_to_ptr.vmem [resolvable:$true] %s357_s28 }
   0xa   :  { %130 = vperm.xlu0 %388, %v28_v5   ;;  %387 = vset.pattern.permute.xlu1 %v421_v7  ;;  %v192_v12 = vld [vmem:[%s573_s2 + $0x28] sm:$0xff]  ;;  %v29_v15 = vld [vmem:[%s572_s1 + $0x38] sm:$0xff]  ;;  %v191_v16 = vld [vmem:[%s573_s2 + $0x20] sm:$0xff]  ;;  %s396_s29 = scalar_lea.vmem %s358_s28, 256  ;;  %p401_p1 = scmp.lt.s32.totalorder %s358_s28, %s358_s28 }
   0xb   :  { %47 = vperm.xlu1 %387, %v25_v6   ;;  %v193_v17 = vld [vmem:[%s573_s2 + $0x30] sm:$0xff]  ;;  %v194_v18 = vld [vmem:[%s573_s2 + $0x38] sm:$0xff]  ;;  %v139_v26 = vsub.s32 1, %v72_v23  ;;  %v143_v27 = vsub.s32 3, %v72_v23  ;;  %v73_v29 = vsub.s32 0, %v72_v23  ;;  %v77_v30 = vsub.s32 2, %v72_v23  ;;  %p397_p0 = scmp.ne.s32.totalorder %s358_s28, %s396_s29  ;;  %p402_p2 = scmp.lt.s32.totalorder %s396_s29, %s396_s29 }
   0xc   :  { %v21_v31 = vld [vmem:[%s571_s0] sm:$0xf] }
   0xd   :  { %v140_v33 = vrot.slane %v21_v31, %v139_v26  ;;  %v144_v34 = vrot.slane %v21_v31, %v143_v27  ;;  %v74_v35 = vrot.slane %v21_v31, %v73_v29  ;;  %v78_v36 = vrot.slane %v21_v31, %v77_v30  ;;  %p403_p3 = por %p402_p2, %p401_p1 }
   0xe   :  { %393 = vset.pattern.permute.xlu0 %v421_v7 }
   0xf   :  { %32 = vperm.xlu0 %393, %v22_v1   ;;  %389 = vset.pattern.permute.xlu1 %v420_v2  ;;  %v512_v39 = vrot.slane %v140_v33, %v139_v26  ;;  %v514_v40 = vrot.slane %v144_v34, %v139_v26  ;;  %v516_v41 = vrot.slane %v74_v35, %v73_v29  ;;  %p404_p4 = pnand %p403_p3, %p397_p0 }
  0x10   :  { %118 = vperm.xlu1 %389, %v25_v6   ;;  %v518_v42 = vrot.slane %v78_v36, %v73_v29 }
  0x13   :  { %37 = vperm.xlu0 %393, %v23_v4  }
  0x14   :  { %390 = vset.pattern.permute.xlu1 %v421_v7 }
  0x15   :  { %197 = vperm.xlu1 %390, %v187_v8  }
  0x17   :  { %42 = vperm.xlu0 %393, %v24_v0  }
  0x19   :  { %52 = vperm.xlu1 %390, %v26_v3  }
  0x1b   :  { %202 = vperm.xlu0 %393, %v188_v9  }
  0x1d   :  { %57 = vperm.xlu1 %390, %v27_v10  }
  0x1f   :  { %212 = vperm.xlu0 %393, %v190_v11  }
  0x21   :  { %391 = vset.pattern.permute.xlu1 %v420_v2 }
  0x22   :  { %126 = vperm.xlu1 %391, %v27_v10  }
  0x23   :  { %222 = vperm.xlu0 %393, %v192_v12  }
  0x26   :  { %392 = vset.pattern.permute.xlu1 %v421_v7 }
  0x27   :  { %207 = vperm.xlu1 %392, %v189_v13   ;;  %271 = vperm.xlu0 %393, %v268_v14  }
  0x2b   :  { %62 = vperm.xlu1 %392, %v28_v5  }
  0x2f   :  { %67 = vperm.xlu1 %392, %v29_v15  }
  0x33   :  { %394 = vset.pattern.permute.xlu1 %v420_v2 }
  0x34   :  { %134 = vperm.xlu1 %394, %v29_v15  }
  0x38   :  { %395 = vset.pattern.permute.xlu1 %v421_v7 }
  0x39   :  { %217 = vperm.xlu1 %395, %v191_v16  }
  0x3d   :  { %227 = vperm.xlu1 %395, %v193_v17  }
  0x41   :  { %232 = vperm.xlu1 %395, %v194_v18  }
  0x81   :  { %v107_v21 = vpop.permute.xlu1 %106  ;;  %v115_v22 = vpop.permute.xlu0 %114 }
  0x82   :  { %v155_v47 = vmul.f32 %v512_v39, %v107_v21  ;;  %v156_v48 = vmul.f32 %v514_v40, %v107_v21  ;;  %v159_v9 = vmul.f32 %v512_v39, %v115_v22  ;;  %v160_v10 = vmul.f32 %v514_v40, %v115_v22 }
  0x85   :  { %v111_v24 = vpop.permute.xlu1 %110  ;;  %v505_v25 = vpop.permute.xlu0 %122 }
  0x86   :  { %v157_v52 = vmul.f32 %v512_v39, %v111_v24  ;;  %v158_v53 = vmul.f32 %v514_v40, %v111_v24 }
  0x89   :  { %v507_v28 = vpop.permute.xlu0 %130 }
  0x8a   :  { %v48_v32 = vpop.permute.xlu1 %47 }
  0x8b   :  { %v95_v11 = vmul.f32 %v516_v41, %v48_v32  ;;  %v96_v12 = vmul.f32 %v518_v42, %v48_v32 }
  0x8e   :  { %v33_v37 = vpop.permute.xlu0 %32 }
  0x8f   :  { %v119_v38 = vpop.permute.xlu1 %118  ;;  %v89_v44 = vmul.f32 %v516_v41, %v33_v37  ;;  %v90_v45 = vmul.f32 %v518_v42, %v33_v37 }
  0x90   :  { %v161_v5 = vmul.f32 %v512_v39, %v119_v38  ;;  %v162_v6 = vmul.f32 %v514_v40, %v119_v38 }
  0x91   :  { %v171_v54 = vadd.f32 %v155_v47, %v89_v44  ;;  %v172_v55 = vadd.f32 %v156_v48, %v90_v45  ;;  %v164_v47 = vmul.f32 %v514_v40, %v505_v25 }
  0x92   :  { %v38_v43 = vpop.permute.xlu0 %37  ;;  %v177_v17 = vadd.f32 %v161_v5, %v95_v11  ;;  %v178_v18 = vadd.f32 %v162_v6, %v96_v12 }
  0x93   :  { %v91_v49 = vmul.f32 %v516_v41, %v38_v43  ;;  %v92_v50 = vmul.f32 %v518_v42, %v38_v43 }
  0x94   :  { %v198_v46 = vpop.permute.xlu1 %197 }
  0x95   :  { %v235_v57 = vadd.f32 %v198_v46, %v171_v54  ;;  %v236_v58 = vadd.f32 %v198_v46, %v172_v55  ;;  %v173_v59 = vadd.f32 %v157_v52, %v91_v49  ;;  %v174_v60 = vadd.f32 %v158_v53, %v92_v50 }
  0x96   :  { %v43_v51 = vpop.permute.xlu0 %42  ;;  %v163_v46 = vmul.f32 %v512_v39, %v505_v25  ;;  %v167_v25 = vmul.f32 %v512_v39, %v507_v28 }
  0x97   :  { %v251_v1 = vmax.f32 %v235_v57, 0.0  ;;  %v252_v3 = vmax.f32 %v236_v58, 0.0  ;;  %v93_v13 = vmul.f32 %v516_v41, %v43_v51  ;;  %v94_v14 = vmul.f32 %v518_v42, %v43_v51 }
  0x98   :  { %v53_v56 = vpop.permute.xlu1 %52 }
  0x99   :  { %v175_v21 = vadd.f32 %v159_v9, %v93_v13  ;;  %v176_v23 = vadd.f32 %v160_v10, %v94_v14  ;;  %v97_v48 = vmul.f32 %v516_v41, %v53_v56  ;;  %v98_v49 = vmul.f32 %v518_v42, %v53_v56 }
  0x9a   :  { %v203_v61 = vpop.permute.xlu0 %202 }
  0x9b   :  { %v237_v62 = vadd.f32 %v203_v61, %v173_v59  ;;  %v238_v63 = vadd.f32 %v203_v61, %v174_v60  ;;  %v179_v54 = vadd.f32 %v163_v46, %v97_v48  ;;  %v180_v55 = vadd.f32 %v164_v47, %v98_v49 }
  0x9c   :  { %v58_v0 = vpop.permute.xlu1 %57 }
  0x9d   :  { %v253_v2 = vmax.f32 %v237_v62, 0.0  ;;  %v254_v4 = vmax.f32 %v238_v63, 0.0  ;;  %v99_v38 = vmul.f32 %v516_v41, %v58_v0  ;;  %v100_v43 = vmul.f32 %v518_v42, %v58_v0 }
  0x9e   :  { %v213_v16 = vpop.permute.xlu0 %212  ;;  %v168_v62 = vmul.f32 %v514_v40, %v507_v28 }
  0x9f   :  { %v366_v7 = vpack.c.bf16 %v254_v4, %v252_v3  ;;  %v368_v8 = vpack.c.bf16 %v253_v2, %v251_v1  ;;  %v241_v19 = vadd.f32 %v213_v16, %v177_v17  ;;  %v242_v20 = vadd.f32 %v213_v16, %v178_v18 }
  0xa1   :  { %v127_v15 = vpop.permute.xlu1 %126  ;;  %367 = vmatprep.subr.bf16.mxu0 %v366_v7  ;;  %v257_v27 = vmax.f32 %v241_v19, 0.0  ;;  %v258_v29 = vmax.f32 %v242_v20, 0.0 }
  0xa2   :  { %369 = vmatpush1.bf16.msra.mxu0 %v368_v8  ;;  %v165_v35 = vmul.f32 %v512_v39, %v127_v15  ;;  %v166_v36 = vmul.f32 %v514_v40, %v127_v15  ;;  %v223_v50 = vpop.permute.xlu0 %222 }
  0xa4   :  { %v181_v44 = vadd.f32 %v165_v35, %v99_v38  ;;  %v182_v45 = vadd.f32 %v166_v36, %v100_v43 }
  0xa6   :  { %v208_v24 = vpop.permute.xlu1 %207  ;;  %v245_v52 = vadd.f32 %v223_v50, %v181_v44  ;;  %v246_v53 = vadd.f32 %v223_v50, %v182_v45 }
  0xa7   :  { %v239_v22 = vadd.f32 %v208_v24, %v175_v21  ;;  %v240_v26 = vadd.f32 %v208_v24, %v176_v23 }
  0xa8   :  { %v261_v56 = vmax.f32 %v245_v52, 0.0  ;;  %v262_v63 = vmax.f32 %v246_v53, 0.0 }
  0xa9   :  { %v255_v30 = vmax.f32 %v239_v22, 0.0  ;;  %v256_v31 = vmax.f32 %v240_v26, 0.0 }
  0xaa   :  { %v63_v32 = vpop.permute.xlu1 %62 }
  0xab   :  { %v370_v33 = vpack.c.bf16 %v258_v29, %v256_v31  ;;  %v372_v34 = vpack.c.bf16 %v257_v27, %v255_v30  ;;  %v101_v57 = vmul.f32 %v516_v41, %v63_v32  ;;  %v102_v58 = vmul.f32 %v518_v42, %v63_v32 }
  0xad   :  { %371 = vmatprep.subr.bf16.mxu0 %v370_v33  ;;  %v183_v5 = vadd.f32 %v167_v25, %v101_v57  ;;  %v184_v6 = vadd.f32 %v168_v62, %v102_v58 }
  0xae   :  { %v68_v37 = vpop.permute.xlu1 %67  ;;  %373 = vmatpush1.bf16.msra.mxu0 %v372_v34 }
  0xaf   :  { %v103_v7 = vmul.f32 %v516_v41, %v68_v37  ;;  %v104_v8 = vmul.f32 %v518_v42, %v68_v37  ;;  %v267_v41 = vld [vmem:[%s574_s3] sm:$0xff]  ;;  %v272_v42 = vpop.permute.xlu0 %271 }
  0xb3   :  { %v135_v51 = vpop.permute.xlu1 %134 }
  0xb4   :  { %v169_v0 = vmul.f32 %v512_v39, %v135_v51  ;;  %v170_v1 = vmul.f32 %v514_v40, %v135_v51 }
  0xb6   :  { %v185_v28 = vadd.f32 %v169_v0, %v103_v7  ;;  %v186_v13 = vadd.f32 %v170_v1, %v104_v8 }
  0xb8   :  { %v218_v59 = vpop.permute.xlu1 %217 }
  0xb9   :  { %v243_v60 = vadd.f32 %v218_v59, %v179_v54  ;;  %v244_v61 = vadd.f32 %v218_v59, %v180_v55 }
  0xbb   :  { %v259_v2 = vmax.f32 %v243_v60, 0.0  ;;  %v260_v3 = vmax.f32 %v244_v61, 0.0 }
  0xbc   :  { %v228_v4 = vpop.permute.xlu1 %227 }
  0xbd   :  { %v374_v9 = vpack.c.bf16 %v262_v63, %v260_v3  ;;  %v376_v10 = vpack.c.bf16 %v261_v56, %v259_v2  ;;  %v247_v11 = vadd.f32 %v228_v4, %v183_v5  ;;  %v248_v12 = vadd.f32 %v228_v4, %v184_v6 }
  0xbf   :  { %375 = vmatprep.subr.bf16.mxu0 %v374_v9  ;;  %v263_v15 = vmax.f32 %v247_v11, 0.0  ;;  %v264_v16 = vmax.f32 %v248_v12, 0.0 }
  0xc0   :  { %v233_v14 = vpop.permute.xlu1 %232  ;;  %377 = vmatpush1.bf16.msra.mxu0 %v376_v10 }
  0xc1   :  { %v249_v39 = vadd.f32 %v233_v14, %v185_v28  ;;  %v250_v40 = vadd.f32 %v233_v14, %v186_v13 }
  0xc3   :  { %v265_v17 = vmax.f32 %v249_v39, 0.0  ;;  %v266_v18 = vmax.f32 %v250_v40, 0.0 }
  0xc5   :  { %v378_v19 = vpack.c.bf16 %v266_v18, %v264_v16  ;;  %v380_v20 = vpack.c.bf16 %v265_v17, %v263_v15 }
  0xc7   :  { %379 = vmatprep.subr.bf16.mxu0 %v378_v19 }
  0xc8   :  { %381 = vmatpush1.bf16.msra.mxu0 %v380_v20 }
  0xcb   :  { %365 = vmatmul.mubr.msk.f32.vlgmr.msra.gmra.mrb[0].mxu0 %vm274_vm0, %v267_v41 }
 0x19e   :  { %v344_v21 = vpop.f32.mrb[0].mxu0 }
 0x19f   :  { %v345_v23 = vadd.f32 %v344_v21, %v272_v42  ;;  %v346_v24 = vpop.f32.mrb[1].mxu0 }
 0x1a0   :  { %v347_v22 = vadd.f32 %v346_v24, %v272_v42 }
 0x1a1   :  { %349 = vst [vmem:[#allocation2] sm:$0xff] %v345_v23 }
 0x1a2   :  { %350 = vst [vmem:[#allocation2 + $0x8] sm:$0xff] %v347_v22 }
 0x1a3   :  { %407 = shalt.err (!%p404_p4)
}
 0x1a4   :  { %s408_s6 = scalar_lea.hbm %s576_s5, 256 }
 0x1a5   :  { %p409_p5 = scmp.ne.s32.totalorder %s576_s5, %s408_s6  ;;  %p412_p6 = scmp.lt.u32.totalorder %s408_s6, %s576_s5 }
 0x1a7   :  { %p414_p7 = pnand %p412_p6, %p409_p5 }
 0x1a9   :  { %417 = shalt.err (!%p414_p7)
}
 0x1aa   :  { %360 = dma.vmem_to_hbm [thread:$0]  %s358_s28, 256, %s576_s5, [#allocation3]  }
 0x1ab   :  { %418 = dma.done.wait [#allocation3], 256  }
 0x1ac   :  { %419 = vsyncadd [#allocation3], 4294967040 }
 0x1ad   :  { %364 = vsyncpa [#allocation3], 1 }

</bundles_post_ra>
